<compile_context>
chip_gen: v7x
topology: tpu7x:2x2x1
jax: 0.10.0
libtpu: 0.0.40
codegen_flags: <defaults>
</compile_context>

<pallas_src>
import functools

import jax
import jax.numpy as jnp
from jax import lax
from jax.experimental import pallas as pl
from jax.experimental.pallas import tpu as pltpu


def _round_up(x, m):
    return (x + m - 1) // m * m


def _padded_vmem_bytes(shape, dtype):
    """Bytes of one VMEM buffer after (8, 128) tile padding of the minor dims."""
    shape = tuple(int(s) for s in shape)
    if len(shape) == 1:
        shape = (1,) + shape
    lead = 1
    for s in shape[:-2]:
        lead *= s
    return (lead * _round_up(shape[-2], 8) * _round_up(shape[-1], 128)
            * jnp.dtype(dtype).itemsize)


def _mcd_kernel(x_ref, weff_ref, beff_ref, tcol_ref, gamma_ref, beta_ref,
                wh_ref, bh_ref, out_ref, rm_acc, s2_acc, *,
                B, T, Tp, K, classes, eps):
    b = pl.program_id(0)

    @pl.when(b == 0)
    def _init():
        rm_acc[...] = jnp.zeros_like(rm_acc)
        s2_acc[...] = jnp.zeros_like(s2_acc)

    # ---- fused pointwise+depthwise conv for ONE batch: K partial matmuls ----
    # xb is the single padded copy of this batch's input; each tap is a static
    # lane-shifted slice of it (no K x im2col materialization).
    xb = x_ref[0]                                           # (C, Lx)
    conv = jnp.dot(weff_ref[0], xb[:, 0:Tp],
                   preferred_element_type=jnp.float32)
    for k in range(1, K):                                   # static unroll
        conv = conv + jnp.dot(weff_ref[k], xb[:, k:k + Tp],
                              preferred_element_type=jnp.float32)
    conv = jnp.maximum(conv + beff_ref[...], 0.0)           # (F, Tp) bias + ReLU

    # ---- masked time reductions as MXU matmuls (mask folded into tcol) ------
    tc = tcol_ref[...]                                      # (Tp, 2): [:,0]=valid/T, [:,1]=valid
    mean_b = jnp.dot(conv, tc, preferred_element_type=jnp.float32)[:, 0:1]   # (F,1)
    s2_b = jnp.dot(conv * conv, tc, preferred_element_type=jnp.float32)[:, 1:2]

    onehot = (lax.broadcasted_iota(jnp.int32, (1, rm_acc.shape[1]), 1) == b
              ).astype(jnp.float32)                         # (1, Bp)
    rm_acc[...] += mean_b * onehot                          # scatter mean to column b
    s2_acc[...] += s2_b

    # ---- finalize: BN (batch stats) + GAP + both FC heads + softmax ---------
    @pl.when(b == pl.num_programs(0) - 1)
    def _finalize():
        rm = rm_acc[...]                                    # (F, Bp) time means
        inv_bt = 1.0 / (B * T)
        s1 = jnp.sum(rm, axis=1, keepdims=True) * float(T)  # (F, 1) total sum
        mu = s1 * inv_bt
        # E[x^2] - mu^2 (biased var) in fp32; post-ReLU values keep it stable.
        var = s2_acc[...] * inv_bt - mu * mu
        scale = gamma_ref[...] * lax.rsqrt(var + eps)       # (F, 1)
        shift = beta_ref[...] - mu * scale                  # (F, 1)
        feat = rm * scale + shift                           # GAP commutes with affine BN

        # both FC heads as one matmul (contract F)
        logits = lax.dot_general(feat, wh_ref[...],
                                 dimension_numbers=(((0,), (0,)), ((), ())),
                                 preferred_element_type=jnp.float32)
        logits = logits + bh_ref[...]                       # (Bp, 2*classes)

        def _softmax(l):
            m = jnp.max(l, axis=1, keepdims=True)
            e = jnp.exp(l - m)
            return e / jnp.sum(e, axis=1, keepdims=True)    # exact normalization

        probs = jnp.concatenate([_softmax(logits[:, :classes]),
                                 _softmax(logits[:, classes:])], axis=1)
        out_ref[...] = probs[:B, :]


def interpretable_cnn_mcd_forward(x_nchw, Wpw, bpw, Wdw, bdw, gamma, beta,
                                  Wfc, bfc, Wfc2, bfc2,
                                  compute_dtype=jnp.float32):
    """x_nchw: (B, 1, C, L) as in the PyTorch module; params in PyTorch shapes.

    Returns (softmax(fc(feat)), softmax(fc2(feat))), each (B, classes).
    compute_dtype=jnp.bfloat16 halves the dominant HBM read on all TPU
    generations (v5e included); accumulation stays fp32.
    """
    x = jnp.squeeze(x_nchw, axis=1).astype(jnp.float32)     # (B, C, L)
    B, C, L = x.shape
    N1 = Wpw.shape[0]
    F, K = Wdw.shape
    d = F // N1
    classes = Wfc.shape[0]
    T = L - K + 1
    Tp = _round_up(T, 128)
    Lx = _round_up(Tp + K - 1, 128)
    Bp = _round_up(B, 128)

    # single zero-padded copy of x (no K x im2col inflation in HBM/VMEM)
    x_pad = jnp.pad(x, ((0, 0), (0, 0), (0, Lx - L))).astype(compute_dtype)

    # fold pointwise + depthwise into per-tap effective weights: (K, F, C)
    grp = jnp.arange(F) // d                                # out channel -> group
    W_eff = (Wdw.T[:, :, None] * Wpw[grp][None, :, :]).astype(compute_dtype)
    b_eff = (bdw + bpw[grp] * jnp.sum(Wdw, axis=1))[:, None]  # (F, 1) fp32

    # masked time-reduction columns: col0 = valid/T (mean), col1 = valid (sum)
    valid = (jnp.arange(Tp) < T).astype(jnp.float32)
    tcol = jnp.stack([valid / T, valid], axis=1)            # (Tp, 2)

    # merged FC heads
    Wh = jnp.concatenate([Wfc, Wfc2], axis=0).T             # (F, 2*classes)
    bh = jnp.concatenate([bfc, bfc2])[None, :]              # (1, 2*classes)

    gamma_f = gamma[:, None]                                # (F, 1)
    beta_f = beta[:, None]                                  # (F, 1)

    # ---- derive VMEM budget from actual (padded, double-buffered) buffers ----
    io_bytes = (
        2 * _padded_vmem_bytes((1, C, Lx), compute_dtype)         # pipelined x tile
        + 2 * _padded_vmem_bytes((K, F, C), compute_dtype)        # resident params
        + 2 * sum(_padded_vmem_bytes(s, jnp.float32) for s in
                  [(F, 1), (Tp, 2), (F, 1), (F, 1),
                   (F, 2 * classes), (1, 2 * classes), (B, 2 * classes)])
        + _padded_vmem_bytes((F, Bp), jnp.float32)                # scratch
        + _padded_vmem_bytes((F, 1), jnp.float32))
    body_bytes = (6 * _padded_vmem_bytes((F, Tp), jnp.float32)    # conv slab temps
                  + 4 * _padded_vmem_bytes((C, Tp), compute_dtype))
    # floor at the v7x scoped default (32 MiB), cap at v7x physical (64 MiB)
    vmem_limit = int(min(64 * 2**20, max(32 * 2**20, 2 * (io_bytes + body_bytes))))

    kernel = functools.partial(_mcd_kernel, B=B, T=T, Tp=Tp, K=K,
                               classes=classes, eps=1e-5)

    def const(shape):
        return pl.BlockSpec(shape, lambda b: tuple(0 for _ in shape))

    out = pl.pallas_call(
        kernel,
        out_shape=jax.ShapeDtypeStruct((B, 2 * classes), jnp.float32),
        grid_spec=pltpu.PrefetchScalarGridSpec(
            num_scalar_prefetch=0,
            grid=(B,),
            in_specs=[
                pl.BlockSpec((1, C, Lx), lambda b: (b, 0, 0)),    # per-batch x tile
                const((K, F, C)),          # effective conv weights (resident)
                const((F, 1)),             # effective bias
                const((Tp, 2)),            # masked time-reduction columns
                const((F, 1)),             # gamma
                const((F, 1)),             # beta
                const((F, 2 * classes)),   # merged FC weights
                const((1, 2 * classes)),   # merged FC bias
            ],
            out_specs=pl.BlockSpec((B, 2 * classes), lambda b: (0, 0)),
            scratch_shapes=[pltpu.VMEM((F, Bp), jnp.float32),     # per-(F, batch) means
                            pltpu.VMEM((F, 1), jnp.float32)]),    # per-F sum of squares
        compiler_params=pltpu.CompilerParams(
            dimension_semantics=("arbitrary",),                   # batch axis is a reduction
            vmem_limit_bytes=vmem_limit),
    )(x_pad, W_eff, b_eff, tcol, gamma_f, beta_f, Wh, bh)

    return out[:, :classes], out[:, classes:]


def ref_forward(x_nchw, Wpw, bpw, Wdw, bdw, gamma, beta, Wfc, bfc, Wfc2, bfc2):
    """Pure-JAX reference mirroring the PyTorch forward exactly."""
    x = jnp.squeeze(x_nchw, axis=1)
    B, C, L = x.shape
    N1 = Wpw.shape[0]
    F, K = Wdw.shape
    d = F // N1
    T = L - K + 1
    inter1 = jnp.einsum('nc,bcl->bnl', Wpw, x) + bpw[None, :, None]
    outs = []
    for o in range(F):
        g = o // d
        acc = bdw[o]
        for k in range(K):
            acc = acc + Wdw[o, k] * inter1[:, g, k:k + T]
        outs.append(acc)
    conv = jnp.maximum(jnp.stack(outs, axis=1), 0.0)        # (B, F, T)
    mean = conv.mean(axis=(0, 2), keepdims=True)
    var = ((conv - mean) ** 2).mean(axis=(0, 2), keepdims=True)
    bn = (conv - mean) / jnp.sqrt(var + 1e-5) * gamma[None, :, None] + beta[None, :, None]
    feat = bn.mean(axis=2)                                  # (B, F)
    l1 = feat @ Wfc.T + bfc[None, :]
    l2 = feat @ Wfc2.T + bfc2[None, :]
    return jax.nn.softmax(l1, axis=1), jax.nn.softmax(l2, axis=1)


def _run_case(case_id, B, C, L, N1, d, K, classes, compute_dtype, atol, rtol, tag):
    F = d * N1
    ks = jax.random.split(jax.random.fold_in(jax.random.PRNGKey(0), case_id), 11)
    x = jax.random.normal(ks[0], (B, 1, C, L), jnp.float32)
    Wpw = 0.3 * jax.random.normal(ks[1], (N1, C), jnp.float32)
    bpw = 0.1 * jax.random.normal(ks[2], (N1,), jnp.float32)
    Wdw = 0.3 * jax.random.normal(ks[3], (F, K), jnp.float32)
    bdw = 0.1 * jax.random.normal(ks[4], (F,), jnp.float32)
    gamma = 1.0 + 0.1 * jax.random.normal(ks[5], (F,), jnp.float32)
    beta = 0.1 * jax.random.normal(ks[6], (F,), jnp.float32)
    Wfc = 0.3 * jax.random.normal(ks[7], (classes, F), jnp.float32)
    bfc = 0.1 * jax.random.normal(ks[8], (classes,), jnp.float32)
    Wfc2 = 0.3 * jax.random.normal(ks[9], (classes, F), jnp.float32)
    bfc2 = 0.1 * jax.random.normal(ks[10], (classes,), jnp.float32)
    params = (Wpw, bpw, Wdw, bdw, gamma, beta, Wfc, bfc, Wfc2, bfc2)

    o1, o2 = interpretable_cnn_mcd_forward(x, *params, compute_dtype=compute_dtype)
    jax.block_until_ready((o1, o2))
    r1, r2 = ref_forward(x, *params)
    assert bool(jnp.allclose(o1, r1, atol=atol, rtol=rtol)), f"{tag}: head1 mismatch"
    assert bool(jnp.allclose(o2, r2, atol=atol, rtol=rtol)), f"{tag}: head2 mismatch"


if __name__ == "__main__":
    # fp32, small shapes scaled down from the module defaults
    _run_case(0, B=4, C=4, L=32, N1=4, d=2, K=8, classes=2,
              compute_dtype=jnp.float32, atol=2e-3, rtol=2e-3, tag="fp32-small")
    # fp32, real channel count / wider feature dim / odd class count
    _run_case(1, B=2, C=12, L=96, N1=10, d=2, K=16, classes=3,
              compute_dtype=jnp.float32, atol=2e-3, rtol=2e-3, tag="fp32-wide")
    # bf16 operand path (recommended on v5e/v6e/v7x), fp32 accumulation
    _run_case(0, B=4, C=4, L=32, N1=4, d=2, K=8, classes=2,
              compute_dtype=jnp.bfloat16, atol=8e-2, rtol=8e-2, tag="bf16-small")
    print("KERNEL_OK")
</pallas_src>

<mosaic_0001>
module attributes {stable_mosaic.version = 11 : i64} {
  func.func @_mcd_kernel(%arg0: i32, %arg1: memref<1x4x256xf32, #tpu.memory_space<vmem>>, %arg2: memref<8x8x4xf32, #tpu.memory_space<vmem>>, %arg3: memref<8x1xf32, #tpu.memory_space<vmem>>, %arg4: memref<128x2xf32, #tpu.memory_space<vmem>>, %arg5: memref<8x1xf32, #tpu.memory_space<vmem>>, %arg6: memref<8x1xf32, #tpu.memory_space<vmem>>, %arg7: memref<8x4xf32, #tpu.memory_space<vmem>>, %arg8: memref<1x4xf32, #tpu.memory_space<vmem>>, %arg9: memref<4x4xf32, #tpu.memory_space<vmem>>, %arg10: memref<8x128xf32, #tpu.memory_space<vmem>>, %arg11: memref<8x1xf32, #tpu.memory_space<vmem>>) attributes {dimension_semantics = [#tpu.dimension_semantics<arbitrary>], iteration_bounds = array<i64: 4>, scalar_prefetch = 0 : i64, scratch_operands = 2 : i64, tpu.core_type = #tpu.core_type<tc>, window_params = [{transform_indices = @transform_0, window_bounds = array<i64: 1, 4, 256>}, {pipeline_mode = #tpu.pipeline_mode<synchronous>, transform_indices = @transform_1, window_bounds = array<i64: 8, 8, 4>}, {pipeline_mode = #tpu.pipeline_mode<synchronous>, transform_indices = @transform_2, window_bounds = array<i64: 8, 1>}, {pipeline_mode = #tpu.pipeline_mode<synchronous>, transform_indices = @transform_3, window_bounds = array<i64: 128, 2>}, {pipeline_mode = #tpu.pipeline_mode<synchronous>, transform_indices = @transform_4, window_bounds = array<i64: 8, 1>}, {pipeline_mode = #tpu.pipeline_mode<synchronous>, transform_indices = @transform_5, window_bounds = array<i64: 8, 1>}, {pipeline_mode = #tpu.pipeline_mode<synchronous>, transform_indices = @transform_6, window_bounds = array<i64: 8, 4>}, {pipeline_mode = #tpu.pipeline_mode<synchronous>, transform_indices = @transform_7, window_bounds = array<i64: 1, 4>}, {pipeline_mode = #tpu.pipeline_mode<synchronous>, transform_indices = @transform_8, window_bounds = array<i64: 4, 4>}]} {
    %c0_i32 = arith.constant 0 : i32
    %0 = arith.cmpi eq, %arg0, %c0_i32 : i32
    %1 = arith.extui %0 : i1 to i32
    %c0_i32_0 = arith.constant 0 : i32
    %2 = arith.cmpi ne, %1, %c0_i32_0 : i32
    scf.if %2 {
      %cst_43 = arith.constant 0.000000e+00 : f32
      %72 = vector.broadcast %cst_43 : f32 to vector<8x128xf32>
      %c0_44 = arith.constant 0 : index
      %c0_45 = arith.constant 0 : index
      %73 = vector.load %arg10[%c0_44, %c0_45] : memref<8x128xf32, #tpu.memory_space<vmem>>, vector<8x128xf32>
      tpu.vector_store %arg10[%c0_44, %c0_45], %72 {strides = array<i32>} : memref<8x128xf32, #tpu.memory_space<vmem>>, vector<8x128xf32>,
      %cst_46 = arith.constant 0.000000e+00 : f32
      %74 = vector.broadcast %cst_46 : f32 to vector<8x1xf32>
      %c0_47 = arith.constant 0 : index
      %c0_48 = arith.constant 0 : index
      %75 = vector.load %arg11[%c0_47, %c0_48] : memref<8x1xf32, #tpu.memory_space<vmem>>, vector<8x1xf32>
      tpu.vector_store %arg11[%c0_47, %c0_48], %74 {strides = array<i32>} : memref<8x1xf32, #tpu.memory_space<vmem>>, vector<8x1xf32>,
    } else {
    }
    %c0 = arith.constant 0 : index
    %c0_1 = arith.constant 0 : index
    %c0_2 = arith.constant 0 : index
    %3 = vector.load %arg1[%c0, %c0_1, %c0_2] : memref<1x4x256xf32, #tpu.memory_space<vmem>>, vector<1x4x256xf32>
    %4 = vector.shape_cast %3 : vector<1x4x256xf32> to vector<4x256xf32>
    %c0_3 = arith.constant 0 : index
    %c0_4 = arith.constant 0 : index
    %c0_5 = arith.constant 0 : index
    %5 = vector.load %arg2[%c0_3, %c0_4, %c0_5] : memref<8x8x4xf32, #tpu.memory_space<vmem>>, vector<1x8x4xf32>
    %6 = vector.shape_cast %5 : vector<1x8x4xf32> to vector<8x4xf32>
    %7 = vector.extract_strided_slice %4 {offsets = [0, 0], sizes = [4, 128], strides = [1, 1]} : vector<4x256xf32> to vector<4x128xf32>
    %cst = arith.constant dense<0.000000e+00> : vector<8x128xf32>
    %8 = tpu.matmul %6, %7, %cst {dimension_numbers = #tpu.dot_dimension_numbers<[1], [0], [0], [1], [0, 0, 1, 1], [], []>} : vector<8x4xf32>, vector<4x128xf32>, vector<8x128xf32> -> vector<8x128xf32>
    %c1 = arith.constant 1 : index
    %c0_6 = arith.constant 0 : index
    %c0_7 = arith.constant 0 : index
    %9 = vector.load %arg2[%c1, %c0_6, %c0_7] : memref<8x8x4xf32, #tpu.memory_space<vmem>>, vector<1x8x4xf32>
    %10 = vector.shape_cast %9 : vector<1x8x4xf32> to vector<8x4xf32>
    %11 = vector.extract_strided_slice %4 {offsets = [0, 1], sizes = [4, 128], strides = [1, 1]} : vector<4x256xf32> to vector<4x128xf32>
    %cst_8 = arith.constant dense<0.000000e+00> : vector<8x128xf32>
    %12 = tpu.matmul %10, %11, %cst_8 {dimension_numbers = #tpu.dot_dimension_numbers<[1], [0], [0], [1], [0, 0, 1, 1], [], []>} : vector<8x4xf32>, vector<4x128xf32>, vector<8x128xf32> -> vector<8x128xf32>
    %13 = arith.addf %8, %12 : vector<8x128xf32>
    %c2 = arith.constant 2 : index
    %c0_9 = arith.constant 0 : index
    %c0_10 = arith.constant 0 : index
    %14 = vector.load %arg2[%c2, %c0_9, %c0_10] : memref<8x8x4xf32, #tpu.memory_space<vmem>>, vector<1x8x4xf32>
    %15 = vector.shape_cast %14 : vector<1x8x4xf32> to vector<8x4xf32>
    %16 = vector.extract_strided_slice %4 {offsets = [0, 2], sizes = [4, 128], strides = [1, 1]} : vector<4x256xf32> to vector<4x128xf32>
    %cst_11 = arith.constant dense<0.000000e+00> : vector<8x128xf32>
    %17 = tpu.matmul %15, %16, %cst_11 {dimension_numbers = #tpu.dot_dimension_numbers<[1], [0], [0], [1], [0, 0, 1, 1], [], []>} : vector<8x4xf32>, vector<4x128xf32>, vector<8x128xf32> -> vector<8x128xf32>
    %18 = arith.addf %13, %17 : vector<8x128xf32>
    %c3 = arith.constant 3 : index
    %c0_12 = arith.constant 0 : index
    %c0_13 = arith.constant 0 : index
    %19 = vector.load %arg2[%c3, %c0_12, %c0_13] : memref<8x8x4xf32, #tpu.memory_space<vmem>>, vector<1x8x4xf32>
    %20 = vector.shape_cast %19 : vector<1x8x4xf32> to vector<8x4xf32>
    %21 = vector.extract_strided_slice %4 {offsets = [0, 3], sizes = [4, 128], strides = [1, 1]} : vector<4x256xf32> to vector<4x128xf32>
    %cst_14 = arith.constant dense<0.000000e+00> : vector<8x128xf32>
    %22 = tpu.matmul %20, %21, %cst_14 {dimension_numbers = #tpu.dot_dimension_numbers<[1], [0], [0], [1], [0, 0, 1, 1], [], []>} : vector<8x4xf32>, vector<4x128xf32>, vector<8x128xf32> -> vector<8x128xf32>
    %23 = arith.addf %18, %22 : vector<8x128xf32>
    %c4 = arith.constant 4 : index
    %c0_15 = arith.constant 0 : index
    %c0_16 = arith.constant 0 : index
    %24 = vector.load %arg2[%c4, %c0_15, %c0_16] : memref<8x8x4xf32, #tpu.memory_space<vmem>>, vector<1x8x4xf32>
    %25 = vector.shape_cast %24 : vector<1x8x4xf32> to vector<8x4xf32>
    %26 = vector.extract_strided_slice %4 {offsets = [0, 4], sizes = [4, 128], strides = [1, 1]} : vector<4x256xf32> to vector<4x128xf32>
    %cst_17 = arith.constant dense<0.000000e+00> : vector<8x128xf32>
    %27 = tpu.matmul %25, %26, %cst_17 {dimension_numbers = #tpu.dot_dimension_numbers<[1], [0], [0], [1], [0, 0, 1, 1], [], []>} : vector<8x4xf32>, vector<4x128xf32>, vector<8x128xf32> -> vector<8x128xf32>
    %28 = arith.addf %23, %27 : vector<8x128xf32>
    %c5 = arith.constant 5 : index
    %c0_18 = arith.constant 0 : index
    %c0_19 = arith.constant 0 : index
    %29 = vector.load %arg2[%c5, %c0_18, %c0_19] : memref<8x8x4xf32, #tpu.memory_space<vmem>>, vector<1x8x4xf32>
    %30 = vector.shape_cast %29 : vector<1x8x4xf32> to vector<8x4xf32>
    %31 = vector.extract_strided_slice %4 {offsets = [0, 5], sizes = [4, 128], strides = [1, 1]} : vector<4x256xf32> to vector<4x128xf32>
    %cst_20 = arith.constant dense<0.000000e+00> : vector<8x128xf32>
    %32 = tpu.matmul %30, %31, %cst_20 {dimension_numbers = #tpu.dot_dimension_numbers<[1], [0], [0], [1], [0, 0, 1, 1], [], []>} : vector<8x4xf32>, vector<4x128xf32>, vector<8x128xf32> -> vector<8x128xf32>
    %33 = arith.addf %28, %32 : vector<8x128xf32>
    %c6 = arith.constant 6 : index
    %c0_21 = arith.constant 0 : index
    %c0_22 = arith.constant 0 : index
    %34 = vector.load %arg2[%c6, %c0_21, %c0_22] : memref<8x8x4xf32, #tpu.memory_space<vmem>>, vector<1x8x4xf32>
    %35 = vector.shape_cast %34 : vector<1x8x4xf32> to vector<8x4xf32>
    %36 = vector.extract_strided_slice %4 {offsets = [0, 6], sizes = [4, 128], strides = [1, 1]} : vector<4x256xf32> to vector<4x128xf32>
    %cst_23 = arith.constant dense<0.000000e+00> : vector<8x128xf32>
    %37 = tpu.matmul %35, %36, %cst_23 {dimension_numbers = #tpu.dot_dimension_numbers<[1], [0], [0], [1], [0, 0, 1, 1], [], []>} : vector<8x4xf32>, vector<4x128xf32>, vector<8x128xf32> -> vector<8x128xf32>
    %38 = arith.addf %33, %37 : vector<8x128xf32>
    %c7 = arith.constant 7 : index
    %c0_24 = arith.constant 0 : index
    %c0_25 = arith.constant 0 : index
    %39 = vector.load %arg2[%c7, %c0_24, %c0_25] : memref<8x8x4xf32, #tpu.memory_space<vmem>>, vector<1x8x4xf32>
    %40 = vector.shape_cast %39 : vector<1x8x4xf32> to vector<8x4xf32>
    %41 = vector.extract_strided_slice %4 {offsets = [0, 7], sizes = [4, 128], strides = [1, 1]} : vector<4x256xf32> to vector<4x128xf32>
    %cst_26 = arith.constant dense<0.000000e+00> : vector<8x128xf32>
    %42 = tpu.matmul %40, %41, %cst_26 {dimension_numbers = #tpu.dot_dimension_numbers<[1], [0], [0], [1], [0, 0, 1, 1], [], []>} : vector<8x4xf32>, vector<4x128xf32>, vector<8x128xf32> -> vector<8x128xf32>
    %43 = arith.addf %38, %42 : vector<8x128xf32>
    %c0_27 = arith.constant 0 : index
    %c0_28 = arith.constant 0 : index
    %44 = vector.load %arg3[%c0_27, %c0_28] : memref<8x1xf32, #tpu.memory_space<vmem>>, vector<8x1xf32>
    %45 = vector.broadcast %44 : vector<8x1xf32> to vector<8x128xf32>
    %46 = arith.addf %43, %45 : vector<8x128xf32>
    %cst_29 = arith.constant 0.000000e+00 : f32
    %47 = vector.broadcast %cst_29 : f32 to vector<8x128xf32>
    %48 = arith.maximumf %46, %47 : vector<8x128xf32>
    %c0_30 = arith.constant 0 : index
    %c0_31 = arith.constant 0 : index
    %49 = vector.load %arg4[%c0_30, %c0_31] : memref<128x2xf32, #tpu.memory_space<vmem>>, vector<128x2xf32>
    %cst_32 = arith.constant dense<0.000000e+00> : vector<8x2xf32>
    %50 = tpu.matmul %48, %49, %cst_32 {dimension_numbers = #tpu.dot_dimension_numbers<[1], [0], [0], [1], [0, 0, 1, 1], [], []>} : vector<8x128xf32>, vector<128x2xf32>, vector<8x2xf32> -> vector<8x2xf32>
    %51 = vector.extract_strided_slice %50 {offsets = [0, 0], sizes = [8, 1], strides = [1, 1]} : vector<8x2xf32> to vector<8x1xf32>
    %52 = arith.mulf %48, %48 : vector<8x128xf32>
    %cst_33 = arith.constant dense<0.000000e+00> : vector<8x2xf32>
    %53 = tpu.matmul %52, %49, %cst_33 {dimension_numbers = #tpu.dot_dimension_numbers<[1], [0], [0], [1], [0, 0, 1, 1], [], []>} : vector<8x128xf32>, vector<128x2xf32>, vector<8x2xf32> -> vector<8x2xf32>
    %54 = vector.extract_strided_slice %53 {offsets = [0, 1], sizes = [8, 1], strides = [1, 1]} : vector<8x2xf32> to vector<8x1xf32>
    %55 = tpu.iota {dimensions = array<i32: 1>} : vector<1x128xi32>
    %56 = vector.broadcast %arg0 : i32 to vector<1x128xi32>
    %57 = arith.cmpi eq, %55, %56 : vector<1x128xi32>
    %58 = arith.extui %57 : vector<1x128xi1> to vector<1x128xi32>
    %59 = arith.sitofp %58 : vector<1x128xi32> to vector<1x128xf32>
    %c0_34 = arith.constant 0 : index
    %c0_35 = arith.constant 0 : index
    %60 = vector.load %arg10[%c0_34, %c0_35] : memref<8x128xf32, #tpu.memory_space<vmem>>, vector<8x128xf32>
    %61 = vector.broadcast %51 : vector<8x1xf32> to vector<8x128xf32>
    %62 = vector.broadcast %59 : vector<1x128xf32> to vector<8x128xf32>
    %63 = arith.mulf %61, %62 : vector<8x128xf32>
    %64 = arith.addf %60, %63 : vector<8x128xf32>
    %c0_36 = arith.constant 0 : index
    %c0_37 = arith.constant 0 : index
    %65 = vector.load %arg10[%c0_36, %c0_37] : memref<8x128xf32, #tpu.memory_space<vmem>>, vector<8x128xf32>
    tpu.vector_store %arg10[%c0_36, %c0_37], %64 {strides = array<i32>} : memref<8x128xf32, #tpu.memory_space<vmem>>, vector<8x128xf32>,
    %c0_38 = arith.constant 0 : index
    %c0_39 = arith.constant 0 : index
    %66 = vector.load %arg11[%c0_38, %c0_39] : memref<8x1xf32, #tpu.memory_space<vmem>>, vector<8x1xf32>
    %67 = arith.addf %66, %54 : vector<8x1xf32>
    %c0_40 = arith.constant 0 : index
    %c0_41 = arith.constant 0 : index
    %68 = vector.load %arg11[%c0_40, %c0_41] : memref<8x1xf32, #tpu.memory_space<vmem>>, vector<8x1xf32>
    tpu.vector_store %arg11[%c0_40, %c0_41], %67 {strides = array<i32>} : memref<8x1xf32, #tpu.memory_space<vmem>>, vector<8x1xf32>,
    %c3_i32 = arith.constant 3 : i32
    %69 = arith.cmpi eq, %arg0, %c3_i32 : i32
    %70 = arith.extui %69 : i1 to i32
    %c0_i32_42 = arith.constant 0 : i32
    %71 = arith.cmpi ne, %70, %c0_i32_42 : i32
    scf.if %71 {
      %c0_43 = arith.constant 0 : index
      %c0_44 = arith.constant 0 : index
      %72 = vector.load %arg10[%c0_43, %c0_44] : memref<8x128xf32, #tpu.memory_space<vmem>>, vector<8x128xf32>
      %cst_45 = arith.constant dense<0.000000e+00> : vector<8xf32>
      %73 = vector.multi_reduction <add>, %72, %cst_45 [1] : vector<8x128xf32> to vector<8xf32>
      %74 = vector.shape_cast %73 : vector<8xf32> to vector<8x1xf32>
      %cst_46 = arith.constant 2.500000e+01 : f32
      %75 = vector.broadcast %cst_46 : f32 to vector<8x1xf32>
      %76 = arith.mulf %74, %75 : vector<8x1xf32>
      %cst_47 = arith.constant 0.00999999977 : f32
      %77 = vector.broadcast %cst_47 : f32 to vector<8x1xf32>
      %78 = arith.mulf %76, %77 : vector<8x1xf32>
      %c0_48 = arith.constant 0 : index
      %c0_49 = arith.constant 0 : index
      %79 = vector.load %arg11[%c0_48, %c0_49] : memref<8x1xf32, #tpu.memory_space<vmem>>, vector<8x1xf32>
      %cst_50 = arith.constant 0.00999999977 : f32
      %80 = vector.broadcast %cst_50 : f32 to vector<8x1xf32>
      %81 = arith.mulf %79, %80 : vector<8x1xf32>
      %82 = arith.mulf %78, %78 : vector<8x1xf32>
      %83 = arith.subf %81, %82 : vector<8x1xf32>
      %c0_51 = arith.constant 0 : index
      %c0_52 = arith.constant 0 : index
      %84 = vector.load %arg5[%c0_51, %c0_52] : memref<8x1xf32, #tpu.memory_space<vmem>>, vector<8x1xf32>
      %cst_53 = arith.constant 9.99999974E-6 : f32
      %85 = vector.broadcast %cst_53 : f32 to vector<8x1xf32>
      %86 = arith.addf %83, %85 : vector<8x1xf32>
      %87 = math.rsqrt %86 : vector<8x1xf32>
      %88 = arith.mulf %84, %87 : vector<8x1xf32>
      %c0_54 = arith.constant 0 : index
      %c0_55 = arith.constant 0 : index
      %89 = vector.load %arg6[%c0_54, %c0_55] : memref<8x1xf32, #tpu.memory_space<vmem>>, vector<8x1xf32>
      %90 = arith.mulf %78, %88 : vector<8x1xf32>
      %91 = arith.subf %89, %90 : vector<8x1xf32>
      %92 = vector.broadcast %88 : vector<8x1xf32> to vector<8x128xf32>
      %93 = arith.mulf %72, %92 : vector<8x128xf32>
      %94 = vector.broadcast %91 : vector<8x1xf32> to vector<8x128xf32>
      %95 = arith.addf %93, %94 : vector<8x128xf32>
      %c0_56 = arith.constant 0 : index
      %c0_57 = arith.constant 0 : index
      %96 = vector.load %arg7[%c0_56, %c0_57] : memref<8x4xf32, #tpu.memory_space<vmem>>, vector<8x4xf32>
      %cst_58 = arith.constant dense<0.000000e+00> : vector<128x4xf32>
      %97 = tpu.matmul %95, %96, %cst_58 {dimension_numbers = #tpu.dot_dimension_numbers<[0], [0], [1], [1], [0, 1, 1, 1], [], []>} : vector<8x128xf32>, vector<8x4xf32>, vector<128x4xf32> -> vector<128x4xf32>
      %c0_59 = arith.constant 0 : index
      %c0_60 = arith.constant 0 : index
      %98 = vector.load %arg8[%c0_59, %c0_60] : memref<1x4xf32, #tpu.memory_space<vmem>>, vector<1x4xf32>
      %99 = vector.broadcast %98 : vector<1x4xf32> to vector<128x4xf32>
      %100 = arith.addf %97, %99 : vector<128x4xf32>
      %101 = vector.extract_strided_slice %100 {offsets = [0, 0], sizes = [128, 2], strides = [1, 1]} : vector<128x4xf32> to vector<128x2xf32>
      %cst_61 = arith.constant dense<0xFF800000> : vector<128xf32>
      %102 = vector.multi_reduction <maximumf>, %101, %cst_61 [1] : vector<128x2xf32> to vector<128xf32>
      %103 = vector.shape_cast %102 : vector<128xf32> to vector<128x1xf32>
      %104 = vector.broadcast %103 : vector<128x1xf32> to vector<128x2xf32>
      %105 = arith.subf %101, %104 : vector<128x2xf32>
      %106 = math.exp %105 : vector<128x2xf32>
      %cst_62 = arith.constant dense<0.000000e+00> : vector<128xf32>
      %107 = vector.multi_reduction <add>, %106, %cst_62 [1] : vector<128x2xf32> to vector<128xf32>
      %108 = vector.shape_cast %107 : vector<128xf32> to vector<128x1xf32>
      %109 = vector.broadcast %108 : vector<128x1xf32> to vector<128x2xf32>
      %110 = arith.divf %106, %109 : vector<128x2xf32>
      %111 = vector.extract_strided_slice %100 {offsets = [0, 2], sizes = [128, 2], strides = [1, 1]} : vector<128x4xf32> to vector<128x2xf32>
      %cst_63 = arith.constant dense<0xFF800000> : vector<128xf32>
      %112 = vector.multi_reduction <maximumf>, %111, %cst_63 [1] : vector<128x2xf32> to vector<128xf32>
      %113 = vector.shape_cast %112 : vector<128xf32> to vector<128x1xf32>
      %114 = vector.broadcast %113 : vector<128x1xf32> to vector<128x2xf32>
      %115 = arith.subf %111, %114 : vector<128x2xf32>
      %116 = math.exp %115 : vector<128x2xf32>
      %cst_64 = arith.constant dense<0.000000e+00> : vector<128xf32>
      %117 = vector.multi_reduction <add>, %116, %cst_64 [1] : vector<128x2xf32> to vector<128xf32>
      %118 = vector.shape_cast %117 : vector<128xf32> to vector<128x1xf32>
      %119 = vector.broadcast %118 : vector<128x1xf32> to vector<128x2xf32>
      %120 = arith.divf %116, %119 : vector<128x2xf32>
      %121 = tpu.concatenate %110, %120 in 1 : vector<128x2xf32>, vector<128x2xf32> -> vector<128x4xf32>
      %122 = vector.extract_strided_slice %121 {offsets = [0, 0], sizes = [4, 4], strides = [1, 1]} : vector<128x4xf32> to vector<4x4xf32>
      %c0_65 = arith.constant 0 : index
      %c0_66 = arith.constant 0 : index
      %123 = vector.load %arg9[%c0_65, %c0_66] : memref<4x4xf32, #tpu.memory_space<vmem>>, vector<4x4xf32>
      tpu.vector_store %arg9[%c0_65, %c0_66], %122 {strides = array<i32>} : memref<4x4xf32, #tpu.memory_space<vmem>>, vector<4x4xf32>,
    } else {
    }
    return
  }
  func.func @transform_0(%arg0: i32) -> (i32, i32, i32) {
    %c0_i32 = arith.constant 0 : i32
    %c0_i32_0 = arith.constant 0 : i32
    %c0_i32_1 = arith.constant 0 : i32
    return %arg0, %c0_i32, %c0_i32_0 : i32, i32, i32
  }
  func.func @transform_1(%arg0: i32) -> (i32, i32, i32) {
    %c0_i32 = arith.constant 0 : i32
    %c0_i32_0 = arith.constant 0 : i32
    %c0_i32_1 = arith.constant 0 : i32
    %c0_i32_2 = arith.constant 0 : i32
    return %c0_i32, %c0_i32_0, %c0_i32_1 : i32, i32, i32
  }
  func.func @transform_2(%arg0: i32) -> (i32, i32) {
    %c0_i32 = arith.constant 0 : i32
    %c0_i32_0 = arith.constant 0 : i32
    %c0_i32_1 = arith.constant 0 : i32
    return %c0_i32, %c0_i32_0 : i32, i32
  }
  func.func @transform_3(%arg0: i32) -> (i32, i32) {
    %c0_i32 = arith.constant 0 : i32
    %c0_i32_0 = arith.constant 0 : i32
    %c0_i32_1 = arith.constant 0 : i32
    return %c0_i32, %c0_i32_0 : i32, i32
  }
  func.func @transform_4(%arg0: i32) -> (i32, i32) {
    %c0_i32 = arith.constant 0 : i32
    %c0_i32_0 = arith.constant 0 : i32
    %c0_i32_1 = arith.constant 0 : i32
    return %c0_i32, %c0_i32_0 : i32, i32
  }
  func.func @transform_5(%arg0: i32) -> (i32, i32) {
    %c0_i32 = arith.constant 0 : i32
    %c0_i32_0 = arith.constant 0 : i32
    %c0_i32_1 = arith.constant 0 : i32
    return %c0_i32, %c0_i32_0 : i32, i32
  }
  func.func @transform_6(%arg0: i32) -> (i32, i32) {
    %c0_i32 = arith.constant 0 : i32
    %c0_i32_0 = arith.constant 0 : i32
    %c0_i32_1 = arith.constant 0 : i32
    return %c0_i32, %c0_i32_0 : i32, i32
  }
  func.func @transform_7(%arg0: i32) -> (i32, i32) {
    %c0_i32 = arith.constant 0 : i32
    %c0_i32_0 = arith.constant 0 : i32
    %c0_i32_1 = arith.constant 0 : i32
    return %c0_i32, %c0_i32_0 : i32, i32
  }
  func.func @transform_8(%arg0: i32) -> (i32, i32) {
    %c0_i32 = arith.constant 0 : i32
    %c0_i32_0 = arith.constant 0 : i32
    %c0_i32_1 = arith.constant 0 : i32
    return %c0_i32, %c0_i32_0 : i32, i32
  }
}

</mosaic_0001>

<bundles_post_ra>
// kernel: tpu_custom_call.1
= control target key start
LH: loop header
LB: loop body
LE: loop exit
PB: predicated region body
PF: predicated region fallthrough
CT: control target
= control target key end

     0   :  { %13 = vsyncpa [#allocation5], 0  ;;  %s1933_s27 = smov 0   ;;  %s2132_s0 = inlined_call_operand.vmem [shape: f32[4,4,256], index: 0, kind: input, shape index: {}]   ;;  %s2133_s1 = inlined_call_operand.vmem [shape: f32[8,8,4], index: 1, kind: input, shape index: {}]   ;;  %s2134_s2 = inlined_call_operand.vmem [shape: f32[8,1], index: 2, kind: input, shape index: {}]   ;;  %s2135_s3 = inlined_call_operand.vmem [shape: f32[128,2], index: 3, kind: input, shape index: {}]   ;;  %s2136_s4 = inlined_call_operand.vmem [shape: f32[8,1], index: 4, kind: input, shape index: {}]   ;;  %s2137_s5 = inlined_call_operand.vmem [shape: f32[8,1], index: 5, kind: input, shape index: {}]   ;;  %s2138_s6 = inlined_call_operand.vmem [shape: f32[8,4], index: 6, kind: input, shape index: {}]   ;;  %s2139_s7 = inlined_call_operand.vmem [shape: f32[1,4], index: 7, kind: input, shape index: {}]   ;;  %s2140_s8 = inlined_call_operand.hbm [shape: f32[4,4], index: 8, kind: output, shape index: {}]  }
   0x1 LB: > { %s1939_s28 = sadd.s32 4294967295, %s1871_s27   ;;  %p1486_p0 = scmp.ge.s32.totalorder %s1871_s27, 1  ;;  %s1871_s27 = sphi %s1933_s27, %s19_s27  }
   0x2   : > { %p258_p1 = scmp.lt.s32.totalorder %s1871_s27, 5 }
   0x4   : > { %p259_p2 = pnand %p1486_p0, %p258_p1 }
   0x5   : > { %p287_p3 = scmp.lt.s32.totalorder (!%p259_p2), %s1939_s28, 3  ;;  %p1489_p4 = scmp.ne.s32.totalorder (!%p259_p2), %s1939_s28, 0 }
   0x6   : > { %262 = sbr.rel (%p259_p2) target bundleno = 1836 (0x72c), region = 52 }
   0xd   : > { %s288_s29 = scalar_select %p287_p3, %s1939_s28, 3 }
   0xe   : > { %295 = sbr.rel (%p1489_p4) target bundleno = 21 (0x15), region = 56  ;;  %vm297_vm0 = vcmask (!%p1489_p4), 7168   ;;  %v1873_v0 = vmov (!%p1489_p4), 0.0  }
   0xf   : > { %s1536_s30 = sshll.u32 %s288_s29, 3  ;;  %296 = vst [vmem:[#allocation2] sm:$0xff] (!%p1489_p4), %v1873_v0  ;;  %298 = vst.msk [vmem:[#allocation3] sm:$0xff] (!%p1489_p4), %vm297_vm0, %v1873_v0 }
  0x10   : > { %s291_s11 = scalar_lea.vmem %s2132_s0, %s1536_s30 }
  0x15 PF: > { %v299_v1 = vld [vmem:[%s291_s11] sm:$0xff]  ;;  %s1874_s12 = smov 126   ;;  %s1875_s13 = smov 127   ;;  %v1876_v3 = vmov 0.0   ;;  %vm1877_vm1 = vmmov 0   ;;  %vm315_vm2 = vcmask 1043456  }
  0x16   : > { %465 = vrot.lane.b32.xlu1 %v299_v1, %s1874_s12  ;;  %305 = vrot.lane.b32.xlu0 %v299_v1, %s1875_s13  ;;  %v304_v2 = vcombine.high %v299_v1, %v299_v1  ;;  %v300_v4 = vld [vmem:[%s2133_s1] sm:$0xff]  ;;  %vm311_vm3 = vcmask 31744   ;;  %s1878_s16 = smov 125   ;;  %s1879_s17 = smov 124   ;;  %v1880_v5 = vmov 0   ;;  %vm309_vm4 = vcmask 1039360  }
  0x17   : > { %1604 = vmatprep.subr.mxu0 %v1876_v3  ;;  %1606 = vmatprep.mubr.msk.f32.mxu0 %vm1877_vm1, %v1876_v3  ;;  %s1881_s18 = smov 123   ;;  %s1882_s19 = smov 122   ;;  %v967_v6 = vld [vmem:[%s2134_s2] sm:$0xff]  ;;  %vm469_vm5 = vcmask 1031168   ;;  %v1490_v11 = vld [vmem:[%s2133_s1 + $0x8] sm:$0xff]  ;;  %vm553_vm6 = vcmask 1022976  }
  0x18   : > { %1609 = vmatprep.subr.mxu1 %v1876_v3  ;;  %1611 = vmatprep.mubr.msk.f32.mxu1 %vm1877_vm1, %v1876_v3  ;;  %s1883_s20 = smov 121   ;;  %v1495_v16 = vld [vmem:[%s2133_s1 + $0x10] sm:$0xff]  ;;  %v1498_v18 = vld [vmem:[%s2133_s1 + $0x18] sm:$0xff]  ;;  %vm637_vm7 = vcmask 1014784   ;;  %v1501_v21 = vld [vmem:[%s2133_s1 + $0x20] sm:$0xff]  ;;  %vm721_vm8 = vcmask 1006592  }
  0x19   : > { %1610 = vmatpush3.msk.msra.mxu1 %vm315_vm2, %v299_v1  ;;  %1820 = vset.pattern.permute.xlu0 %v1880_v5  ;;  %v1504_v25 = vld [vmem:[%s2133_s1 + $0x28] sm:$0xff]  ;;  %v975_v27 = vld [vmem:[%s2135_s3] sm:$0xff]  ;;  %vm805_vm9 = vcmask 998400   ;;  %v1507_v31 = vld [vmem:[%s2133_s1 + $0x30] sm:$0xff]  ;;  %vm889_vm10 = vcmask 990208   ;;  %v1884_v36 = vmov 0.0|0.0  }
  0x1a   : > { %467 = vrot.lane.b32.xlu1 %v304_v2, %s1874_s12  ;;  %307 = vrot.lane.b32.xlu0 %v304_v2, %s1875_s13  ;;  %v976_v28 = vld [vmem:[%s2135_s3 + $0x8] sm:$0xff]  ;;  %v977_v34 = vld [vmem:[%s2135_s3 + $0x10] sm:$0xff]  ;;  %vm1153_vm12 = vcmask 7168   ;;  %p1514_p5 = scmp.ne.s32.totalorder %s1939_s28, 3 }
  0x1b   : > { %1619 = vmatprep.subr.mxu1 %v1876_v3  ;;  %1612 = vmatmul.mubr.msk.f32.vlgmr.msra.gmra.mrb[0].mxu1 %vm311_vm3, %v300_v4  ;;  %v1741_v32 = vpack.c.bf16 %v976_v28, %v975_v27  ;;  %v978_v35 = vld [vmem:[%s2135_s3 + $0x18] sm:$0xff]  ;;  %v979_v42 = vld [vmem:[%s2135_s3 + $0x20] sm:$0xff]  ;;  %v980_v43 = vld [vmem:[%s2135_s3 + $0x28] sm:$0xff]  ;;  %v1132_v28 = vlaneseq  ;;  %vm1227_vm13 = vcmask (!%p1514_p5), 64512   ;;  %vm1418_vm14 = vcmask (!%p1514_p5), 31760  }
  0x1c   : > { %1621 = vmatprep.mubr.msk.f32.mxu1 %vm1877_vm1, %v1876_v3  ;;  %1821 = vset.pattern.permute.xlu1 %v1880_v5  ;;  %v1510_v39 = vld [vmem:[%s2133_s1 + $0x38] sm:$0xff]  ;;  %v1744_v40 = vpack.c.bf16 %v978_v35, %v977_v34  ;;  %v1747_v44 = vpack.c.bf16 %v980_v43, %v979_v42  ;;  %v981_v45 = vld [vmem:[%s2135_s3 + $0x30] sm:$0xff]  ;;  %v983_v48 = vld [vmem:[%s2135_s3 + $0x40] sm:$0xff]  ;;  %vm1406_vm15 = vcmask (!%p1514_p5), 15360   ;;  %vm1435_vm0 = vcmask (!%p1514_p5), 27648  }
  0x1d   : > { %v982_v46 = vld [vmem:[%s2135_s3 + $0x38] sm:$0xff]  ;;  %v984_v49 = vld [vmem:[%s2135_s3 + $0x48] sm:$0xff]  ;;  %v985_v53 = vld [vmem:[%s2135_s3 + $0x50] sm:$0xff] }
  0x1e   : > { %551 = vrot.lane.b32.xlu1 %v304_v2, %s1878_s16  ;;  %549 = vrot.lane.b32.xlu0 %v299_v1, %s1878_s16  ;;  %v1750_v47 = vpack.c.bf16 %v982_v46, %v981_v45  ;;  %v1753_v50 = vpack.c.bf16 %v984_v49, %v983_v48  ;;  %v986_v54 = vld [vmem:[%s2135_s3 + $0x58] sm:$0xff]  ;;  %v987_v56 = vld [vmem:[%s2135_s3 + $0x60] sm:$0xff]  ;;  %v1147_v35 = vld [vmem:[#allocation3] sm:$0xff] }
  0x1f   : > { %v1756_v55 = vpack.c.bf16 %v986_v54, %v985_v53  ;;  %v988_v57 = vld [vmem:[%s2135_s3 + $0x68] sm:$0xff]  ;;  %v989_v59 = vld [vmem:[%s2135_s3 + $0x70] sm:$0xff]  ;;  %v990_v60 = vld [vmem:[%s2135_s3 + $0x78] sm:$0xff] }
  0x20   : > { %v1759_v58 = vpack.c.bf16 %v988_v57, %v987_v56  ;;  %v1762_v61 = vpack.c.bf16 %v990_v60, %v989_v59  ;;  %v1168_v48 = vld [vmem:[%s2136_s4] sm:$0xff] (!%p1514_p5) }
  0x22   : > { %635 = vrot.lane.b32.xlu1 %v304_v2, %s1879_s17  ;;  %633 = vrot.lane.b32.xlu0 %v299_v1, %s1879_s17 }
  0x26   : > { %719 = vrot.lane.b32.xlu1 %v304_v2, %s1881_s18  ;;  %717 = vrot.lane.b32.xlu0 %v299_v1, %s1881_s18 }
  0x2a   : > { %803 = vrot.lane.b32.xlu1 %v304_v2, %s1882_s19  ;;  %801 = vrot.lane.b32.xlu0 %v299_v1, %s1882_s19  ;;  %s1886_s19 = smov (!%p1514_p5), 126  }
  0x2e   : > { %887 = vrot.lane.b32.xlu1 %v304_v2, %s1883_s20  ;;  %885 = vrot.lane.b32.xlu0 %v299_v1, %s1883_s20 }
  0x32   : > { %970 = vperm.xlu0 %1820, %v967_v6  }
  0x88   : > { %v466_v7 = vpop.permute.xlu1 %465  ;;  %v306_v8 = vpop.permute.xlu0 %305 }
  0x8c   : > { %v468_v9 = vpop.permute.xlu1 %467  ;;  %v308_v10 = vpop.permute.xlu0 %307 }
  0x8d   : > { %v310_v12 = vsel %vm309_vm4, %v306_v8, %v308_v10  ;;  %v470_v13 = vsel %vm469_vm5, %v466_v7, %v468_v9 }
  0x8e   : > { %1605 = vmatpush3.msk.msra.mxu0 %vm315_vm2, %v310_v12 }
  0x8f   : > { %1614 = vmatprep.subr.mxu0 %v1876_v3  ;;  %1607 = vmatmul.mubr.msk.f32.vlgmr.msra.gmra.mrb[0].mxu0 %vm311_vm3, %v1490_v11 }
  0x90   : > { %v552_v14 = vpop.permute.xlu1 %551  ;;  %1615 = vmatpush3.msk.msra.mxu0 %vm315_vm2, %v470_v13  ;;  %v550_v15 = vpop.permute.xlu0 %549  ;;  %1616 = vmatprep.mubr.msk.f32.mxu0 %vm1877_vm1, %v1876_v3 }
  0x91   : > { %v554_v17 = vsel %vm553_vm6, %v550_v15, %v552_v14  ;;  %1624 = vmatprep.subr.mxu0 %v1876_v3 }
  0x92   : > { %1620 = vmatpush3.msk.msra.mxu1 %vm315_vm2, %v554_v17 }
  0x93   : > { %1617 = vmatmul.mubr.msk.f32.vlgmr.msra.gmra.mrb[2].mxu0 %vm311_vm3, %v1495_v16  ;;  %1629 = vmatprep.subr.mxu1 %v1876_v3 }
  0x94   : > { %v636_v19 = vpop.permute.xlu1 %635  ;;  %v634_v20 = vpop.permute.xlu0 %633  ;;  %1622 = vmatmul.mubr.msk.f32.vlgmr.msra.gmra.mrb[2].mxu1 %vm311_vm3, %v1498_v18  ;;  %1626 = vmatprep.mubr.msk.f32.mxu0 %vm1877_vm1, %v1876_v3 }
  0x95   : > { %v638_v22 = vsel %vm637_vm7, %v634_v20, %v636_v19  ;;  %1631 = vmatprep.mubr.msk.f32.mxu1 %vm1877_vm1, %v1876_v3 }
  0x96   : > { %1625 = vmatpush3.msk.msra.mxu0 %vm315_vm2, %v638_v22 }
  0x97   : > { %1627 = vmatmul.mubr.msk.f32.vlgmr.msra.gmra.mrb[4].mxu0 %vm311_vm3, %v1501_v21  ;;  %1634 = vmatprep.subr.mxu0 %v1876_v3 }
  0x98   : > { %v720_v23 = vpop.permute.xlu1 %719  ;;  %v718_v24 = vpop.permute.xlu0 %717  ;;  %1636 = vmatprep.mubr.msk.f32.mxu0 %vm1877_vm1, %v1876_v3 }
  0x99   : > { %v722_v26 = vsel %vm721_vm8, %v718_v24, %v720_v23 }
  0x9a   : > { %1630 = vmatpush3.msk.msra.mxu1 %vm315_vm2, %v722_v26 }
  0x9b   : > { %1632 = vmatmul.mubr.msk.f32.vlgmr.msra.gmra.mrb[4].mxu1 %vm311_vm3, %v1504_v25  ;;  %1639 = vmatprep.subr.mxu1 %v1876_v3 }
  0x9c   : > { %v804_v29 = vpop.permute.xlu1 %803  ;;  %v802_v30 = vpop.permute.xlu0 %801  ;;  %1641 = vmatprep.mubr.msk.f32.mxu1 %vm1877_vm1, %v1876_v3 }
  0x9d   : > { %v806_v33 = vsel %vm805_vm9, %v802_v30, %v804_v29  ;;  %v1133_v29 = vand.u32 127, %v1132_v28  ;;  %v1134_v30 = vstv %s1939_s28 }
  0x9e   : > { %1635 = vmatpush3.msk.msra.mxu0 %vm315_vm2, %v806_v33 }
  0x9f   : > { %1637 = vmatmul.mubr.msk.f32.vlgmr.msra.gmra.mrb[6].mxu0 %vm311_vm3, %v1507_v31  ;;  %1740 = vmatprep.subr.bf16.mxu0 %v1884_v36  ;;  %vm1135_vm11 = vcmp.eq.s32.totalorder %v1133_v29, %v1134_v30 }
  0xa0   : > { %v888_v37 = vpop.permute.xlu1 %887  ;;  %v886_v38 = vpop.permute.xlu0 %885  ;;  %1742 = vmatpush3.bf16.msra.mxu0 %v1741_v32  ;;  %1676 = vmatprep.mubr.msk.f32.mxu0 %vm1877_vm1, %v1876_v3  ;;  %v1513_v31 = vsel %vm1135_vm11, 1.0, %v1876_v3 }
  0xa1   : > { %v890_v41 = vsel %vm889_vm10, %v886_v38, %v888_v37  ;;  %1743 = vmatprep.subr.bf16.mxu0 %v1884_v36 }
  0xa2   : > { %1640 = vmatpush3.msk.msra.mxu1 %vm315_vm2, %v890_v41 }
  0xa3   : > { %1642 = vmatmul.mubr.msk.f32.vlgmr.msra.gmra.mrb[6].mxu1 %vm311_vm3, %v1510_v39  ;;  %1764 = vmatprep.subr.bf16.mxu1 %v1884_v36 }
  0xa4   : > { %1766 = vmatpush3.bf16.msra.mxu1 %v1741_v32  ;;  %1745 = vmatpush3.bf16.msra.mxu0 %v1744_v40  ;;  %v1138_v32 = vld [vmem:[#allocation2] sm:$0xff] }
  0xa5   : > { %1767 = vmatprep.subr.bf16.mxu1 %v1884_v36  ;;  %1746 = vmatprep.subr.bf16.mxu0 %v1884_v36 }
  0xa6   : > { %1711 = vmatprep.mubr.msk.f32.mxu1 %vm1877_vm1, %v1876_v3 }
  0xa8   : > { %1769 = vmatpush3.bf16.msra.mxu1 %v1744_v40  ;;  %1748 = vmatpush3.bf16.msra.mxu0 %v1747_v44  ;;  %v1885_v40 = vmov (!%p1514_p5), 0  }
  0xa9   : > { %1770 = vmatprep.subr.bf16.mxu1 %v1884_v36  ;;  %1749 = vmatprep.subr.bf16.mxu0 %v1884_v36 }
  0xaa   : > { %1823 = vset.pattern.permute.xlu0 (!%p1514_p5), %v1885_v40 }
  0xac   : > { %1772 = vmatpush3.bf16.msra.mxu1 %v1747_v44  ;;  %1751 = vmatpush3.bf16.msra.mxu0 %v1750_v47 }
  0xad   : > { %1773 = vmatprep.subr.bf16.mxu1 %v1884_v36  ;;  %1752 = vmatprep.subr.bf16.mxu0 %v1884_v36 }
  0xb0   : > { %1775 = vmatpush3.bf16.msra.mxu1 %v1750_v47  ;;  %1754 = vmatpush3.bf16.msra.mxu0 %v1753_v50 }
  0xb1   : > { %1776 = vmatprep.subr.bf16.mxu1 %v1884_v36  ;;  %1755 = vmatprep.subr.bf16.mxu0 %v1884_v36  ;;  %v971_v18 = vpop.permute.xlu0 %970 }
  0xb4   : > { %1778 = vmatpush3.bf16.msra.mxu1 %v1753_v50  ;;  %1757 = vmatpush3.bf16.msra.mxu0 %v1756_v55 }
  0xb5   : > { %1779 = vmatprep.subr.bf16.mxu1 %v1884_v36  ;;  %1758 = vmatprep.subr.bf16.mxu0 %v1884_v36 }
  0xb8   : > { %1781 = vmatpush3.bf16.msra.mxu1 %v1756_v55  ;;  %1760 = vmatpush3.bf16.msra.mxu0 %v1759_v58 }
  0xb9   : > { %1782 = vmatprep.subr.bf16.mxu1 %v1884_v36  ;;  %1761 = vmatprep.subr.bf16.mxu0 %v1884_v36 }
  0xbc   : > { %1784 = vmatpush3.bf16.msra.mxu1 %v1759_v58  ;;  %1763 = vmatpush3.bf16.msra.mxu0 %v1762_v61  ;;  %v1187_v58 = vld [vmem:[%s2138_s6] sm:$0xff] (!%p1514_p5) }
  0xbd   : > { %1785 = vmatprep.subr.bf16.mxu1 %v1884_v36  ;;  %1714 = vmatprep.subr.mxu0 (!%p1514_p5), %v1187_v58 }
  0xc0   : > { %1787 = vmatpush3.bf16.msra.mxu1 %v1762_v61 }
  0xc1   : > { %1788 = vmatprep.subr.mxu1 (!%p1514_p5), %v1187_v58 }
  0xee   : > { %v459_v51 = vpop.f32.mrb[0].mxu1 }
  0xef   : > { %v1613_v52 = vpop.f32.mrb[1].mxu1 }
 0x162   : > { %v384_v62 = vpop.f32.mrb[0].mxu0 }
 0x163   : > { %v460_v63 = vadd.f32 %v459_v51, %v384_v62  ;;  %v1608_v0 = vpop.f32.mrb[1].mxu0  ;;  %v1172_v51 = vld [vmem:[%s2137_s5] sm:$0xff] (!%p1514_p5) }
 0x166   : > { %v542_v1 = vpop.f32.mrb[2].mxu0 }
 0x167   : > { %v546_v2 = vadd.f32 %v542_v1, %v460_v63  ;;  %v626_v4 = vpop.f32.mrb[2].mxu1  ;;  %v1618_v5 = vpop.f32.mrb[3].mxu0 }
 0x168   : > { %v1623_v6 = vpop.f32.mrb[3].mxu1 }
 0x169   : > { %v630_v7 = vadd.f32 %v626_v4, %v546_v2 }
 0x16a   : > { %v710_v8 = vpop.f32.mrb[4].mxu0 }
 0x16b   : > { %v714_v9 = vadd.f32 %v710_v8, %v630_v7  ;;  %v1628_v10 = vpop.f32.mrb[5].mxu0 }
 0x16e   : > { %v794_v11 = vpop.f32.mrb[4].mxu1 }
 0x16f   : > { %v798_v12 = vadd.f32 %v794_v11, %v714_v9  ;;  %v1633_v13 = vpop.f32.mrb[5].mxu1 }
 0x172   : > { %v878_v14 = vpop.f32.mrb[6].mxu0 }
 0x173   : > { %v882_v15 = vadd.f32 %v878_v14, %v798_v12  ;;  %v1638_v16 = vpop.f32.mrb[7].mxu0  ;;  %v1515_v12 = vld [vmem:[%s2139_s7] ss:$0 sm:$0xff] (!%p1514_p5) }
 0x176   : > { %v962_v17 = vpop.f32.mrb[6].mxu1 }
 0x177   : > { %v966_v19 = vadd.f32 %v962_v17, %v882_v15  ;;  %v1643_v20 = vpop.f32.mrb[7].mxu1 }
 0x179   : > { %v973_v21 = vadd.f32 %v971_v18, %v966_v19 }
 0x17b   : > { %v974_v22 = vmax.f32 %v973_v21, 0.0 }
 0x17d   : > { %v1061_v23 = vmul.f32 %v974_v22, %v974_v22  ;;  %1677 = vmatmul.mubr.f32.vlgmr.msra.gmra.mrb[8].mxu0 %v974_v22 }
 0x17e   : > { %1715 = vmatpush3.msra.mxu0 (!%p1514_p5), %v1187_v58 }
 0x17f   : > { %1712 = vmatmul.mubr.f32.vlgmr.msra.gmra.mrb[8].mxu1 %v1061_v23 }
 0x180   : > { %1789 = vmatpush3.msra.mxu1 (!%p1514_p5), %v1187_v58 }
 0x250   : > { %v1057_v24 = vpop.f32.mrb[8].mxu0 }
 0x251   : > { %1141 = vperm.xlu1 %1821, %v1057_v24   ;;  %v1678_v25 = vpop.f32.mrb[9].mxu0 }
 0x252   : > { %v1128_v26 = vpop.f32.mrb[8].mxu1 }
 0x253   : > { %v1713_v27 = vpop.f32.mrb[9].mxu1 }
 0x255   : > { %1149 = vrot.lane.b32.xlu1 %v1128_v26, %s1875_s13 }
 0x256   : > { %1824 = vset.pattern.permute.xlu1 (!%p1514_p5), %v1885_v40 }
 0x2d0   : > { %v1142_v33 = vpop.permute.xlu1 %1141 }
 0x2d1   : > { %v1144_v34 = vmul.f32 %v1513_v31, %v1142_v33  ;;  %1158 = sbr.rel (%p1514_p5) target bundleno = 1811 (0x713), region = 60 }
 0x2d3   : > { %v1145_v36 = vadd.f32 %v1144_v34, %v1138_v32 }
 0x2d4   : > { %v1150_v37 = vpop.permute.xlu1 %1149 }
 0x2d5   : > { %1146 = vst [vmem:[#allocation2] sm:$0xff] %v1145_v36  ;;  %v1152_v38 = vadd.f32 %v1150_v37, %v1147_v35 }
 0x2d7   : > { %1154 = vst.msk [vmem:[#allocation3] sm:$0xff] %vm1153_vm12, %v1152_v38 }
 0x2dc   : > { %v1159_v39 = vld [vmem:[#allocation2] sm:$0xff] }
 0x2dd   : > { %1160 = vadd.xlane.f32.xlu0 %v1159_v39 }
 0x2de   : > { %v1164_v41 = vld [vmem:[#allocation3] sm:$0xff] }
 0x2df   : > { %v1165_v43 = vmul.f32 0.01, %v1164_v41 }
 0x36a   : > { %v1161_v3 = vpop.xlane.xlu0 %1160 }
 0x36b   : > { %v1162_v42 = vmul.f32 25.0, %v1161_v3 }
 0x36d   : > { %v1163_v44 = vmul.f32 0.01, %v1162_v42 }
 0x36f   : > { %v1166_v45 = vmul.f32 %v1163_v44, %v1163_v44 }
 0x371   : > { %v1167_v46 = vsub.f32 %v1165_v43, %v1166_v45 }
 0x373   : > { %v1169_v47 = vadd.f32 1e-05, %v1167_v46 }
 0x375   : > { %1825 = vrsqrt.f32 %v1169_v47 }
 0x37f   : > { %v1826_v49 = vpop.eup %1825 }
 0x380   : > { %v1171_v50 = vmul.f32 %v1826_v49, %v1168_v48 }
 0x382   : > { %v1173_v52 = vmul.f32 %v1171_v50, %v1163_v44  ;;  %1177 = vperm.xlu0 %1823, %v1171_v50  }
 0x384   : > { %v1174_v53 = vsub.f32 %v1172_v51, %v1173_v52 }
 0x386   : > { %1183 = vperm.xlu1 %1824, %v1174_v53  }
 0x401   : > { %v1178_v54 = vpop.permute.xlu0 %1177 }
 0x402   : > { %v1180_v55 = vmul.f32 %v1178_v54, %v1159_v39 }
 0x405   : > { %v1184_v56 = vpop.permute.xlu1 %1183 }
 0x406   : > { %v1186_v57 = vadd.f32 %v1184_v56, %v1180_v55 }
 0x408   : > { %1195 = vxpose.xlu1.b32.start.end [1/1] (short) %v1186_v57, 128 }
 0x488   : > { %v1211_v59 = vpop.trf.xlu1 }
 0x489   : > { %1716 = vmatprep.mubr.msk.f32.mxu0 %vm1227_vm13, %v1211_v59 }
 0x48c   : > { %v1212_v60 = vpop.trf.xlu1 }
 0x48d   : > { %1717 = vmatmul.mubr.msk.f32.vlgmr.msra.gmra.mrb[0].mxu0 %vm1227_vm13, %v1212_v60 }
 0x490   : > { %v1213_v61 = vpop.trf.xlu1 }
 0x491   : > { %1719 = vmatprep.mubr.msk.f32.mxu0 %vm1227_vm13, %v1213_v61 }
 0x494   : > { %v1214_v62 = vpop.trf.xlu1 }
 0x495   : > { %1720 = vmatmul.mubr.msk.f32.gmra.mrb[2].mxu0 %vm1227_vm13, %v1214_v62 }
 0x498   : > { %v1215_v63 = vpop.trf.xlu1 }
 0x499   : > { %1722 = vmatprep.mubr.msk.f32.mxu0 %vm1227_vm13, %v1215_v63 }
 0x49c   : > { %v1216_v0 = vpop.trf.xlu1 }
 0x49d   : > { %1723 = vmatmul.mubr.msk.f32.gmra.mrb[4].mxu0 %vm1227_vm13, %v1216_v0 }
 0x4a0   : > { %v1217_v1 = vpop.trf.xlu1 }
 0x4a1   : > { %1725 = vmatprep.mubr.msk.f32.mxu0 %vm1227_vm13, %v1217_v1 }
 0x4a4   : > { %v1218_v2 = vpop.trf.xlu1 }
 0x4a5   : > { %1726 = vmatmul.mubr.msk.f32.gmra.mrb[6].mxu0 %vm1227_vm13, %v1218_v2 }
 0x4a8   : > { %v1219_v4 = vpop.trf.xlu1 }
 0x4a9   : > { %1728 = vmatprep.mubr.msk.f32.mxu1 %vm1227_vm13, %v1219_v4 }
 0x4ac   : > { %v1220_v5 = vpop.trf.xlu1 }
 0x4ad   : > { %1729 = vmatmul.mubr.msk.f32.vlgmr.msra.gmra.mrb[0].mxu1 %vm1227_vm13, %v1220_v5 }
 0x4b0   : > { %v1221_v6 = vpop.trf.xlu1 }
 0x4b1   : > { %1731 = vmatprep.mubr.msk.f32.mxu1 %vm1227_vm13, %v1221_v6 }
 0x4b4   : > { %v1222_v7 = vpop.trf.xlu1 }
 0x4b5   : > { %1732 = vmatmul.mubr.msk.f32.gmra.mrb[2].mxu1 %vm1227_vm13, %v1222_v7 }
 0x4b8   : > { %v1223_v8 = vpop.trf.xlu1 }
 0x4b9   : > { %1734 = vmatprep.mubr.msk.f32.mxu1 %vm1227_vm13, %v1223_v8 }
 0x4bc   : > { %v1224_v9 = vpop.trf.xlu1 }
 0x4bd   : > { %1735 = vmatmul.mubr.msk.f32.gmra.mrb[4].mxu1 %vm1227_vm13, %v1224_v9 }
 0x4c0   : > { %v1225_v10 = vpop.trf.xlu1 }
 0x4c1   : > { %1737 = vmatprep.mubr.msk.f32.mxu1 %vm1227_vm13, %v1225_v10 }
 0x4c4   : > { %v1226_v11 = vpop.trf.xlu1 }
 0x4c5   : > { %1738 = vmatmul.mubr.msk.f32.gmra.mrb[6].mxu1 %vm1227_vm13, %v1226_v11 }
 0x560   : > { %v1718_v13 = vpop.f32.mrb[0].mxu0 }
 0x561   : > { %v1342_v14 = vpop.f32.mrb[1].mxu0 }
 0x562   : > { %v1343_v15 = vadd.f32 %v1515_v12, %v1342_v14 }
 0x564   : > { %v1419_v16 = vsel %vm1418_vm14, %v1343_v15, -inf  ;;  %v1407_v17 = vsel %vm1406_vm15, %v1343_v15, -inf }
 0x565   : > { %1420 = vmax.xlane.f32.xlu1 %v1419_v16  ;;  %1408 = vmax.xlane.f32.xlu0 %v1407_v17 }
 0x568   : > { %v1721_v18 = vpop.f32.mrb[2].mxu0 }
 0x569   : > { %v1351_v19 = vpop.f32.mrb[3].mxu0 }
 0x570   : > { %v1724_v20 = vpop.f32.mrb[4].mxu0 }
 0x571   : > { %v1359_v21 = vpop.f32.mrb[5].mxu0 }
 0x578   : > { %v1727_v22 = vpop.f32.mrb[6].mxu0 }
 0x579   : > { %v1367_v23 = vpop.f32.mrb[7].mxu0 }
 0x580   : > { %v1730_v24 = vpop.f32.mrb[0].mxu1 }
 0x581   : > { %v1375_v25 = vpop.f32.mrb[1].mxu1 }
 0x588   : > { %v1733_v26 = vpop.f32.mrb[2].mxu1 }
 0x589   : > { %v1383_v27 = vpop.f32.mrb[3].mxu1 }
 0x590   : > { %v1736_v28 = vpop.f32.mrb[4].mxu1 }
 0x591   : > { %v1391_v29 = vpop.f32.mrb[5].mxu1 }
 0x598   : > { %v1739_v30 = vpop.f32.mrb[6].mxu1 }
 0x599   : > { %v1399_v31 = vpop.f32.mrb[7].mxu1 }
 0x5f2   : > { %v1421_v32 = vpop.xlane.xlu1 %1420  ;;  %v1409_v36 = vpop.xlane.xlu0 %1408 }
 0x5f3   : > { %v1422_v33 = vsub.f32 %v1343_v15, %v1421_v32  ;;  %v1410_v37 = vsub.f32 %v1343_v15, %v1409_v36 }
 0x5f5   : > { %v1423_v34 = vmul.f32 1.442695, %v1422_v33  ;;  %v1411_v38 = vmul.f32 1.442695, %v1410_v37 }
 0x5f7   : > { %1827 = vpow2.f32 %v1423_v34 }
 0x5f8   : > { %1829 = vpow2.f32 %v1411_v38 }
 0x601   : > { %v1828_v35 = vpop.eup %1827 }
 0x602   : > { %1426 = vrot.lane.b32.xlu0 %v1828_v35, %s1886_s19  ;;  %v1830_v39 = vpop.eup %1829 }
 0x603   : > { %v1413_v40 = vsel %vm1406_vm15, %v1830_v39, 0.0 }
 0x621   : > { %1414 = vadd.xlane.f32.xlu0 %v1413_v40 }
 0x674   : > { %v1427_v41 = vpop.permute.xlu0 %1426 }
 0x675   : > { %v1429_v3 = vsel %vm1406_vm15, %v1427_v41, 0.0 }
 0x676   : > { %1430 = vadd.xlane.f32.xlu0 %v1429_v3 }
 0x6ae   : > { %v1415_v42 = vpop.xlane.xlu0 %1414 }
 0x6af   : > { %1831 = vrcp.f32 %v1415_v42 }
 0x6b9   : > { %v1832_v44 = vpop.eup %1831 }
 0x6ba   : > { %v1417_v46 = vmul.f32 %v1832_v44, %v1830_v39 }
 0x703   : > { %v1431_v43 = vpop.xlane.xlu0 %1430 }
 0x704   : > { %1833 = vrcp.f32 %v1431_v43 }
 0x70e   : > { %v1834_v45 = vpop.eup %1833 }
 0x70f   : > { %v1433_v47 = vmul.f32 %v1834_v45, %v1828_v35 }
 0x711   : > { %v1434_v48 = vsel %vm1406_vm15, %v1417_v46, %v1433_v47 }
 0x712   : > { %1436 = vst.msk [vmem:[#allocation4] sm:$0xf] %vm1435_vm0, %v1434_v48 }
 0x713 PF: > { %p1794_p6 = scmp.eq.s32.totalorder %s1939_s28, 3  ;;  %s1887_s20 = smov [#allocation4]  }
 0x714   : > { %s1444_s21 = sshll.u32 %s1887_s20, 4  ;;  %s1445_s21 = int_to_ptr.vmem [resolvable:$true] %s1444_s21 }
 0x715   : > { %s1835_s22 = scalar_lea.vmem %s1445_s21, 64  ;;  %p1842_p10 = scmp.lt.s32.totalorder %s1445_s21, %s1445_s21 }
 0x716   : > { %p1836_p7 = scmp.ne.s32.totalorder %s1445_s21, %s1835_s22  ;;  %p1843_p11 = scmp.lt.s32.totalorder %s1835_s22, %s1835_s22 }
 0x718   : > { %p1837_p8 = pnand %p1836_p7, %p1794_p6  ;;  %p1844_p12 = por %p1843_p11, %p1842_p10 }
 0x71a   : > { %p1838_p9 = pneg %p1837_p8 }
 0x71c   : > { %p1845_p13 = pnand %p1844_p12, %p1838_p9 }
 0x71e   : > { %1848 = shalt.err (!%p1845_p13)
}
 0x71f   : > { %s1849_s25 = scalar_lea.hbm %s2140_s8, 64 }
 0x720   : > { %p1850_p0 = scmp.ne.s32.totalorder %s2140_s8, %s1849_s25  ;;  %p1855_p3 = scmp.lt.u32.totalorder %s1849_s25, %s2140_s8 }
 0x722   : > { %p1851_p1 = pnand %p1850_p0, %p1794_p6 }
 0x724   : > { %p1852_p2 = pneg %p1851_p1 }
 0x726   : > { %p1857_p4 = pnand %p1855_p3, %p1852_p2 }
 0x728   : > { %1860 = shalt.err (!%p1857_p4)
}
 0x729   : > { %1791 = dma.vmem_to_hbm [thread:$0]  (%p1794_p6), %s1445_s21, 64, %s2140_s8, [#allocation5]  }
 0x72a   : > { %1866 = dma.done.wait (%p1794_p6), [#allocation5], 64  }
 0x72b   : > { %1868 = vsyncadd (%p1794_p6), [#allocation5], 4294967232 }
 0x72c PF: > { %s19_s27 = sadd.s32 1, %s1871_s27  }
 0x72d   : > { %p16_p5 = scmp.ge.s32.totalorder %s19_s27, 6  }
 0x72f   :  { %18 = sbr.rel (!%p16_p5) target bundleno = 1 (0x1), region = 94 }
 0x736   :  { %1457 = vsyncpa [#allocation5], 1 }
 0x737   :  { %1459 = vsyncpa [#allocation5 + $0x1], 1 }

</bundles_post_ra>
